<compile_context>
chip_gen: v6e
topology: v6e:2x2x1
jax: 0.10.0
libtpu: 0.0.40
codegen_flags: <defaults>
</compile_context>

<pallas_src>
import functools

import jax
import jax.numpy as jnp
from jax.experimental import pallas as pl
from jax.experimental.pallas import tpu as pltpu

BN_EPS = 1e-5
LANE = 128
SUBLANE_BF16 = 16  # bf16 packs 16 rows per vreg sublane group


def _round_up(x, m):
    return (x + m - 1) // m * m


def _pad2d(a, rows, cols):
    r, c = a.shape
    return jnp.pad(a, ((0, rows - r), (0, cols - c)))


def _vmem_capacity_bytes():
    """Physical VMEM of the current chip; conservative fallback (v7x) if unknown."""
    try:
        info = pltpu.get_tpu_info()
        cap = getattr(info, "vmem_capacity_bytes", None)
        if cap:
            return int(cap)
    except Exception:
        pass
    return 64 * 1024 * 1024


# ---------------------------------------------------------------------------
# Parameter preparation: pad / cast ONCE per model, not per forward call.
# ---------------------------------------------------------------------------
def prepare_mlp_params(params, input_dim):
    num_layers = len(params["linears"])
    w_last, b_last = params["linears"][-1]
    out_dim = w_last.shape[1]
    dims = [input_dim] + [w.shape[1] for (w, _b) in params["linears"]]
    dims_pad = [_round_up(d, LANE) for d in dims]

    ws = []
    for i, (w, _b) in enumerate(params["linears"]):
        # Hidden-layer biases are dropped: they cancel exactly under training-mode BN.
        ws.append(_pad2d(w, dims_pad[i], dims_pad[i + 1]).astype(jnp.bfloat16))

    gbs = []  # per hidden layer: (2, hid_pad) f32, row0=gamma row1=beta
    for (gamma, beta) in params["bns"]:
        hid_pad = _round_up(gamma.shape[-1], LANE)
        g = _pad2d(gamma.reshape(1, -1), 1, hid_pad)
        b = _pad2d(beta.reshape(1, -1), 1, hid_pad)
        gbs.append(jnp.concatenate([g, b], axis=0).astype(jnp.float32))

    b_last_p = _pad2d(b_last.reshape(1, -1), 1, dims_pad[-1]).astype(jnp.float32)

    return {
        "num_layers": num_layers,
        "out_dim": out_dim,
        "dims_pad": dims_pad,
        "ws": ws,
        "gbs": gbs,
        "b_last": b_last_p,
    }


# ---------------------------------------------------------------------------
# Path 1: whole MLP in one single-block call (small graphs: activations never
# leave VMEM between layers).
# ---------------------------------------------------------------------------
def _fused_mlp_kernel(*refs, num_hidden, n_valid, n_pad):
    """refs = (x, [w_i, gammabeta_i] * num_hidden, w_last, b_last, out)."""
    x_ref = refs[0]
    o_ref = refs[-1]
    b_last_ref = refs[-2]
    w_last_ref = refs[-3]

    need_mask = n_valid != n_pad
    if need_mask:
        row_ids = jax.lax.broadcasted_iota(jnp.int32, (n_pad, 1), 0)
        row_mask = row_ids < n_valid
    inv_n = jnp.float32(1.0 / n_valid)

    cur = x_ref[...]  # bf16 (n_pad, in_pad); padded rows/cols are zero
    for i in range(num_hidden):
        w_ref = refs[1 + 2 * i]
        gb_ref = refs[2 + 2 * i]
        gamma = gb_ref[0:1, :]
        beta = gb_ref[1:2, :]

        # Linear (bias omitted: cancels under training-mode BN).
        z = jnp.dot(cur, w_ref[...], preferred_element_type=jnp.float32)

        # BN stats via E[z^2] - mean^2: padded rows of `cur` are exactly zero so
        # they contribute nothing to the sums -> no mask multiply needed here.
        s = jnp.sum(z, axis=0, keepdims=True)
        ss = jnp.sum(z * z, axis=0, keepdims=True)
        mean = s * inv_n
        var = jnp.maximum(ss * inv_n - mean * mean, 0.0)  # clamp: cancellation safety
        scale = gamma * jax.lax.rsqrt(var + BN_EPS)        # gamma folded into rsqrt
        shift = beta - mean * scale
        pre = z * scale + shift
        if need_mask:
            # Single select fuses the ReLU with the padded-row mask (keeps the
            # next layer's statistics clean).
            act = jnp.where(jnp.logical_and(row_mask, pre > 0.0), pre, 0.0)
        else:
            act = jnp.maximum(pre, 0.0)
        cur = act.astype(jnp.bfloat16)

    out = jnp.dot(cur, w_last_ref[...], preferred_element_type=jnp.float32)
    o_ref[...] = (out + b_last_ref[...]).astype(o_ref.dtype)


def _mlp_forward_single(prep, x, vmem_limit):
    n, _ = x.shape
    dims = prep["dims_pad"]
    num_hidden = prep["num_layers"] - 1
    n_pad = _round_up(max(n, SUBLANE_BF16), SUBLANE_BF16)

    inputs = [_pad2d(x, n_pad, dims[0]).astype(jnp.bfloat16)]
    for i in range(num_hidden):
        inputs.append(prep["ws"][i])
        inputs.append(prep["gbs"][i])
    inputs.append(prep["ws"][-1])
    inputs.append(prep["b_last"])

    kernel = functools.partial(
        _fused_mlp_kernel, num_hidden=num_hidden, n_valid=n, n_pad=n_pad)

    out = pl.pallas_call(
        kernel,
        out_shape=jax.ShapeDtypeStruct((n_pad, dims[-1]), jnp.float32),
        in_specs=[pl.BlockSpec(memory_space=pltpu.MemorySpace.VMEM)] * len(inputs),
        out_specs=pl.BlockSpec(memory_space=pltpu.MemorySpace.VMEM),
        compiler_params=pltpu.CompilerParams(vmem_limit_bytes=vmem_limit),
    )(*inputs)
    return out[:n, :prep["out_dim"]]


# ---------------------------------------------------------------------------
# Path 2: batch-tiled grid, two-pass BatchNorm.
#   Each per-layer call: (optionally) normalize+ReLU the previous layer's
#   pre-activations with precomputed per-feature scale/shift, matmul with the
#   resident weight, write z tiles, and emit per-tile sum / sum-of-squares.
#   The tiny per-feature stats reduction happens outside in plain JAX.
# ---------------------------------------------------------------------------
def _tiled_layer_kernel(*refs, normalize_input, emit_stats, add_bias,
                        need_mask, tile_m, n_valid):
    idx = 0
    if normalize_input:
        norm_ref = refs[idx]; idx += 1            # (2, d_in) f32: row0=scale row1=shift
    x_ref = refs[idx]; idx += 1                    # (tile_m, d_in)
    w_ref = refs[idx]; idx += 1                    # (d_in, d_out) bf16
    if add_bias:
        b_ref = refs[idx]; idx += 1                # (1, d_out) f32
    z_ref = refs[idx]; idx += 1                    # (tile_m, d_out) f32
    if emit_stats:
        stats_ref = refs[idx]; idx += 1            # (1, 2, d_out) f32

    if normalize_input:
        scale = norm_ref[0:1, :]
        shift = norm_ref[1:2, :]
        pre = x_ref[...] * scale + shift           # f32
        if need_mask:
            row0 = pl.program_id(0) * tile_m
            row_ids = row0 + jax.lax.broadcasted_iota(jnp.int32, (tile_m, 1), 0)
            act = jnp.where(jnp.logical_and(row_ids < n_valid, pre > 0.0), pre, 0.0)
        else:
            act = jnp.maximum(pre, 0.0)
        a = act.astype(jnp.bfloat16)
    else:
        a = x_ref[...]                              # raw bf16 input; padded rows are zero

    z = jnp.dot(a, w_ref[...], preferred_element_type=jnp.float32)
    if add_bias:
        z = z + b_ref[...]
    z_ref[...] = z

    if emit_stats:
        s = jnp.sum(z, axis=0, keepdims=True)
        ss = jnp.sum(z * z, axis=0, keepdims=True)
        stats = jnp.concatenate([s, ss], axis=0)    # (2, d_out)
        stats_ref[...] = stats.reshape((1,) + stats.shape)


def _mlp_forward_tiled(prep, x, tile_m, vmem_limit):
    n, _ = x.shape
    dims = prep["dims_pad"]
    num_layers = prep["num_layers"]

    # M tile: 256 suits v6e/v7x 256x256 MXUs; pass 128 on v5e. Multiple of 16
    # (bf16 sublane packing), clamped for small batches.
    tile_m = _round_up(max(SUBLANE_BF16, min(tile_m, _round_up(n, SUBLANE_BF16))),
                       SUBLANE_BF16)
    n_pad = _round_up(n, tile_m)
    num_tiles = n_pad // tile_m
    rows_padded = n_pad != n

    sem = pltpu.CompilerParams(dimension_semantics=("parallel",),
                               vmem_limit_bytes=vmem_limit)

    cur = _pad2d(x, n_pad, dims[0]).astype(jnp.bfloat16)
    norm = None
    out = None
    for li in range(num_layers):
        last = li == num_layers - 1
        d_in, d_out = dims[li], dims[li + 1]
        normalize_input = li > 0
        emit_stats = not last
        add_bias = last

        inputs, in_specs = [], []
        if normalize_input:
            inputs.append(norm)
            in_specs.append(pl.BlockSpec((2, d_in), lambda i: (0, 0)))
        inputs.append(cur)
        in_specs.append(pl.BlockSpec((tile_m, d_in), lambda i: (i, 0)))
        inputs.append(prep["ws"][li])
        in_specs.append(pl.BlockSpec((d_in, d_out), lambda i: (0, 0)))
        if add_bias:
            inputs.append(prep["b_last"])
            in_specs.append(pl.BlockSpec((1, d_out), lambda i: (0, 0)))

        kernel = functools.partial(
            _tiled_layer_kernel,
            normalize_input=normalize_input,
            emit_stats=emit_stats,
            add_bias=add_bias,
            need_mask=(rows_padded and normalize_input and emit_stats),
            tile_m=tile_m,
            n_valid=n,
        )

        z_shape = jax.ShapeDtypeStruct((n_pad, d_out), jnp.float32)
        z_spec = pl.BlockSpec((tile_m, d_out), lambda i: (i, 0))

        if emit_stats:
            stats_shape = jax.ShapeDtypeStruct((num_tiles, 2, d_out), jnp.float32)
            stats_spec = pl.BlockSpec((1, 2, d_out), lambda i: (i, 0, 0))
            z, stats = pl.pallas_call(
                kernel,
                grid=(num_tiles,),
                out_shape=(z_shape, stats_shape),
                in_specs=in_specs,
                out_specs=(z_spec, stats_spec),
                compiler_params=sem,
            )(*inputs)
            # Tiny per-feature reduction + BN constants outside the kernel.
            s = jnp.sum(stats[:, 0, :], axis=0)
            ss = jnp.sum(stats[:, 1, :], axis=0)
            mean = s / n
            var = jnp.maximum(ss / n - mean * mean, 0.0)
            gamma = prep["gbs"][li][0]
            beta = prep["gbs"][li][1]
            scale = gamma * jax.lax.rsqrt(var + BN_EPS)
            shift = beta - mean * scale
            norm = jnp.stack([scale, shift]).astype(jnp.float32)  # (2, d_out)
            cur = z
        else:
            out = pl.pallas_call(
                kernel,
                grid=(num_tiles,),
                out_shape=z_shape,
                in_specs=in_specs,
                out_specs=z_spec,
                compiler_params=sem,
            )(*inputs)

    return out[:n, :prep["out_dim"]]


# ---------------------------------------------------------------------------
# Forward entry point.
# ---------------------------------------------------------------------------
def mlp_forward(prep, x, *, tile_m=256, path="auto"):
    """path: "auto" | "single" | "tiled"."""
    cap = _vmem_capacity_bytes()
    budget = cap // 4 * 3              # ~96 MiB on v5e/v6e, ~48 MiB on v7x
    vmem_limit = budget

    n = x.shape[0]
    dims = prep["dims_pad"]
    n_pad = _round_up(max(n, SUBLANE_BF16), SUBLANE_BF16)

    # Single-block footprint estimate (inputs + output + f32 intermediates headroom).
    est = 2 * n_pad * dims[0]
    est += sum(w.size * w.dtype.itemsize for w in prep["ws"])
    est += sum(g.size * 4 for g in prep["gbs"]) + prep["b_last"].size * 4
    est += 4 * n_pad * dims[-1]
    est += 3 * 4 * n_pad * max(dims)

    if path == "single" or (path == "auto" and est <= budget):
        return _mlp_forward_single(prep, x, vmem_limit)
    return _mlp_forward_tiled(prep, x, tile_m, vmem_limit)


# ---------------------------------------------------------------------------
# Parameter construction (PyTorch-default init, weights stored as (in, out)).
# ---------------------------------------------------------------------------
def init_mlp_params(key, num_layers, input_dim, hidden_dim, output_dim):
    if num_layers < 1:
        raise ValueError("number of layers should be positive!")
    params = {"linears": [], "bns": []}
    dims = (
        [(input_dim, output_dim)]
        if num_layers == 1
        else [(input_dim, hidden_dim)]
        + [(hidden_dim, hidden_dim)] * (num_layers - 2)
        + [(hidden_dim, output_dim)]
    )
    for (din, dout) in dims:
        key, kw, kb = jax.random.split(key, 3)
        bound = 1.0 / (din ** 0.5)
        w = jax.random.uniform(kw, (din, dout), jnp.float32, -bound, bound)
        b = jax.random.uniform(kb, (1, dout), jnp.float32, -bound, bound)
        params["linears"].append((w, b))
    for _ in range(num_layers - 1):
        params["bns"].append(
            (jnp.ones((1, hidden_dim), jnp.float32),
             jnp.zeros((1, hidden_dim), jnp.float32))
        )
    return params


# ---------------------------------------------------------------------------
# Pure-JAX reference (full BN math including the hidden biases, which cancel —
# demonstrating the kernels' bias-drop is exact). Same bf16-operand / f32-acc
# matmuls as the kernels.
# ---------------------------------------------------------------------------
def mlp_reference(params, x, num_layers):
    def mm(a, b):
        return jnp.dot(a.astype(jnp.bfloat16), b.astype(jnp.bfloat16),
                       preferred_element_type=jnp.float32)

    if num_layers == 1:
        w, b = params["linears"][0]
        return mm(x, w) + b
    h = x
    for i in range(num_layers - 1):
        w, b = params["linears"][i]
        gamma, beta = params["bns"][i]
        z = mm(h, w) + b
        mean = jnp.mean(z, axis=0, keepdims=True)
        var = jnp.mean((z - mean) ** 2, axis=0, keepdims=True)
        z = (z - mean) * jax.lax.rsqrt(var + BN_EPS) * gamma + beta
        h = jnp.maximum(z, 0.0)
    w, b = params["linears"][-1]
    return mm(h, w) + b


if __name__ == "__main__":
    num_layers = 3
    input_dim = 16
    hidden_dim = 32
    output_dim = 8

    key = jax.random.PRNGKey(0)
    key, kx1, kx2 = jax.random.split(key, 3)
    params = init_mlp_params(key, num_layers, input_dim, hidden_dim, output_dim)
    prep = prepare_mlp_params(params, input_dim)   # pad/cast once, reused per call

    # 1) Small batch -> single-block fused path (everything resident in VMEM).
    x_small = jax.random.normal(kx1, (8, input_dim), jnp.float32)
    out_s = jax.block_until_ready(mlp_forward(prep, x_small))
    ref_s = jax.block_until_ready(mlp_reference(params, x_small, num_layers))
    assert out_s.shape == (8, output_dim)
    assert jnp.allclose(out_s, ref_s, atol=1e-3, rtol=1e-3), "single-block mismatch"

    # 2) Larger batch forced down the batch-tiled two-pass-BN grid path
    #    (small tile so multiple grid steps + row masking are exercised).
    x_big = jax.random.normal(kx2, (200, input_dim), jnp.float32)
    out_t = jax.block_until_ready(mlp_forward(prep, x_big, tile_m=64, path="tiled"))
    ref_t = jax.block_until_ready(mlp_reference(params, x_big, num_layers))
    assert out_t.shape == (200, output_dim)
    assert jnp.allclose(out_t, ref_t, atol=1e-3, rtol=1e-3), "tiled-path mismatch"

    print("KERNEL_OK")
</pallas_src>

<mosaic_0001>
module attributes {stable_mosaic.version = 11 : i64} {
  func.func @_fused_mlp_kernel(%arg0: memref<16x128xbf16, #tpu.memory_space<vmem>>, %arg1: memref<128x128xbf16, #tpu.memory_space<vmem>>, %arg2: memref<2x128xf32, #tpu.memory_space<vmem>>, %arg3: memref<128x128xbf16, #tpu.memory_space<vmem>>, %arg4: memref<2x128xf32, #tpu.memory_space<vmem>>, %arg5: memref<128x128xbf16, #tpu.memory_space<vmem>>, %arg6: memref<1x128xf32, #tpu.memory_space<vmem>>, %arg7: memref<16x128xf32, #tpu.memory_space<vmem>>) attributes {dimension_semantics = [], scalar_prefetch = 0 : i64, scratch_operands = 0 : i64, tpu.core_type = #tpu.core_type<tc>} {
    %0 = tpu.iota {dimensions = array<i32: 0>} : vector<16x1xi32>
    %c8_i32 = arith.constant 8 : i32
    %1 = vector.broadcast %c8_i32 : i32 to vector<16x1xi32>
    %2 = arith.cmpi slt, %0, %1 : vector<16x1xi32>
    %c0 = arith.constant 0 : index
    %c0_0 = arith.constant 0 : index
    %3 = vector.load %arg0[%c0, %c0_0] : memref<16x128xbf16, #tpu.memory_space<vmem>>, vector<16x128xbf16>
    %c0_1 = arith.constant 0 : index
    %c0_2 = arith.constant 0 : index
    %4 = vector.load %arg2[%c0_1, %c0_2] : memref<2x128xf32, #tpu.memory_space<vmem>>, vector<1x128xf32>
    %c1 = arith.constant 1 : index
    %c0_3 = arith.constant 0 : index
    %5 = vector.load %arg2[%c1, %c0_3] : memref<2x128xf32, #tpu.memory_space<vmem>>, vector<1x128xf32>
    %c0_4 = arith.constant 0 : index
    %c0_5 = arith.constant 0 : index
    %6 = vector.load %arg1[%c0_4, %c0_5] : memref<128x128xbf16, #tpu.memory_space<vmem>>, vector<128x128xbf16>
    %cst = arith.constant dense<0.000000e+00> : vector<16x128xf32>
    %7 = tpu.matmul %3, %6, %cst {dimension_numbers = #tpu.dot_dimension_numbers<[1], [0], [0], [1], [0, 0, 1, 1], [], []>} : vector<16x128xbf16>, vector<128x128xbf16>, vector<16x128xf32> -> vector<16x128xf32>
    %cst_6 = arith.constant dense<0.000000e+00> : vector<128xf32>
    %8 = vector.multi_reduction <add>, %7, %cst_6 [0] : vector<16x128xf32> to vector<128xf32>
    %9 = vector.shape_cast %8 : vector<128xf32> to vector<1x128xf32>
    %10 = arith.mulf %7, %7 : vector<16x128xf32>
    %cst_7 = arith.constant dense<0.000000e+00> : vector<128xf32>
    %11 = vector.multi_reduction <add>, %10, %cst_7 [0] : vector<16x128xf32> to vector<128xf32>
    %12 = vector.shape_cast %11 : vector<128xf32> to vector<1x128xf32>
    %cst_8 = arith.constant 1.250000e-01 : f32
    %13 = vector.broadcast %cst_8 : f32 to vector<1x128xf32>
    %14 = arith.mulf %9, %13 : vector<1x128xf32>
    %cst_9 = arith.constant 1.250000e-01 : f32
    %15 = vector.broadcast %cst_9 : f32 to vector<1x128xf32>
    %16 = arith.mulf %12, %15 : vector<1x128xf32>
    %17 = arith.mulf %14, %14 : vector<1x128xf32>
    %18 = arith.subf %16, %17 : vector<1x128xf32>
    %cst_10 = arith.constant 0.000000e+00 : f32
    %19 = vector.broadcast %cst_10 : f32 to vector<1x128xf32>
    %20 = arith.maximumf %18, %19 : vector<1x128xf32>
    %cst_11 = arith.constant 9.99999974E-6 : f32
    %21 = vector.broadcast %cst_11 : f32 to vector<1x128xf32>
    %22 = arith.addf %20, %21 : vector<1x128xf32>
    %23 = math.rsqrt %22 : vector<1x128xf32>
    %24 = arith.mulf %4, %23 : vector<1x128xf32>
    %25 = arith.mulf %14, %24 : vector<1x128xf32>
    %26 = arith.subf %5, %25 : vector<1x128xf32>
    %27 = vector.broadcast %24 : vector<1x128xf32> to vector<16x128xf32>
    %28 = arith.mulf %7, %27 : vector<16x128xf32>
    %29 = vector.broadcast %26 : vector<1x128xf32> to vector<16x128xf32>
    %30 = arith.addf %28, %29 : vector<16x128xf32>
    %cst_12 = arith.constant 0.000000e+00 : f32
    %31 = vector.broadcast %cst_12 : f32 to vector<16x128xf32>
    %32 = arith.cmpf ogt, %30, %31 : vector<16x128xf32>
    %33 = vector.broadcast %2 : vector<16x1xi1> to vector<16x128xi1>
    %34 = arith.andi %33, %32 : vector<16x128xi1>
    %cst_13 = arith.constant 0.000000e+00 : f32
    %35 = vector.broadcast %cst_13 : f32 to vector<16x128xf32>
    %36 = arith.select %34, %30, %35 : vector<16x128xi1>, vector<16x128xf32>
    %37 = arith.truncf %36 : vector<16x128xf32> to vector<16x128xbf16>
    %c0_14 = arith.constant 0 : index
    %c0_15 = arith.constant 0 : index
    %38 = vector.load %arg4[%c0_14, %c0_15] : memref<2x128xf32, #tpu.memory_space<vmem>>, vector<1x128xf32>
    %c1_16 = arith.constant 1 : index
    %c0_17 = arith.constant 0 : index
    %39 = vector.load %arg4[%c1_16, %c0_17] : memref<2x128xf32, #tpu.memory_space<vmem>>, vector<1x128xf32>
    %c0_18 = arith.constant 0 : index
    %c0_19 = arith.constant 0 : index
    %40 = vector.load %arg3[%c0_18, %c0_19] : memref<128x128xbf16, #tpu.memory_space<vmem>>, vector<128x128xbf16>
    %cst_20 = arith.constant dense<0.000000e+00> : vector<16x128xf32>
    %41 = tpu.matmul %37, %40, %cst_20 {dimension_numbers = #tpu.dot_dimension_numbers<[1], [0], [0], [1], [0, 0, 1, 1], [], []>} : vector<16x128xbf16>, vector<128x128xbf16>, vector<16x128xf32> -> vector<16x128xf32>
    %cst_21 = arith.constant dense<0.000000e+00> : vector<128xf32>
    %42 = vector.multi_reduction <add>, %41, %cst_21 [0] : vector<16x128xf32> to vector<128xf32>
    %43 = vector.shape_cast %42 : vector<128xf32> to vector<1x128xf32>
    %44 = arith.mulf %41, %41 : vector<16x128xf32>
    %cst_22 = arith.constant dense<0.000000e+00> : vector<128xf32>
    %45 = vector.multi_reduction <add>, %44, %cst_22 [0] : vector<16x128xf32> to vector<128xf32>
    %46 = vector.shape_cast %45 : vector<128xf32> to vector<1x128xf32>
    %cst_23 = arith.constant 1.250000e-01 : f32
    %47 = vector.broadcast %cst_23 : f32 to vector<1x128xf32>
    %48 = arith.mulf %43, %47 : vector<1x128xf32>
    %cst_24 = arith.constant 1.250000e-01 : f32
    %49 = vector.broadcast %cst_24 : f32 to vector<1x128xf32>
    %50 = arith.mulf %46, %49 : vector<1x128xf32>
    %51 = arith.mulf %48, %48 : vector<1x128xf32>
    %52 = arith.subf %50, %51 : vector<1x128xf32>
    %cst_25 = arith.constant 0.000000e+00 : f32
    %53 = vector.broadcast %cst_25 : f32 to vector<1x128xf32>
    %54 = arith.maximumf %52, %53 : vector<1x128xf32>
    %cst_26 = arith.constant 9.99999974E-6 : f32
    %55 = vector.broadcast %cst_26 : f32 to vector<1x128xf32>
    %56 = arith.addf %54, %55 : vector<1x128xf32>
    %57 = math.rsqrt %56 : vector<1x128xf32>
    %58 = arith.mulf %38, %57 : vector<1x128xf32>
    %59 = arith.mulf %48, %58 : vector<1x128xf32>
    %60 = arith.subf %39, %59 : vector<1x128xf32>
    %61 = vector.broadcast %58 : vector<1x128xf32> to vector<16x128xf32>
    %62 = arith.mulf %41, %61 : vector<16x128xf32>
    %63 = vector.broadcast %60 : vector<1x128xf32> to vector<16x128xf32>
    %64 = arith.addf %62, %63 : vector<16x128xf32>
    %cst_27 = arith.constant 0.000000e+00 : f32
    %65 = vector.broadcast %cst_27 : f32 to vector<16x128xf32>
    %66 = arith.cmpf ogt, %64, %65 : vector<16x128xf32>
    %67 = vector.broadcast %2 : vector<16x1xi1> to vector<16x128xi1>
    %68 = arith.andi %67, %66 : vector<16x128xi1>
    %cst_28 = arith.constant 0.000000e+00 : f32
    %69 = vector.broadcast %cst_28 : f32 to vector<16x128xf32>
    %70 = arith.select %68, %64, %69 : vector<16x128xi1>, vector<16x128xf32>
    %71 = arith.truncf %70 : vector<16x128xf32> to vector<16x128xbf16>
    %c0_29 = arith.constant 0 : index
    %c0_30 = arith.constant 0 : index
    %72 = vector.load %arg5[%c0_29, %c0_30] : memref<128x128xbf16, #tpu.memory_space<vmem>>, vector<128x128xbf16>
    %cst_31 = arith.constant dense<0.000000e+00> : vector<16x128xf32>
    %73 = tpu.matmul %71, %72, %cst_31 {dimension_numbers = #tpu.dot_dimension_numbers<[1], [0], [0], [1], [0, 0, 1, 1], [], []>} : vector<16x128xbf16>, vector<128x128xbf16>, vector<16x128xf32> -> vector<16x128xf32>
    %c0_32 = arith.constant 0 : index
    %c0_33 = arith.constant 0 : index
    %74 = vector.load %arg6[%c0_32, %c0_33] : memref<1x128xf32, #tpu.memory_space<vmem>>, vector<1x128xf32>
    %75 = vector.broadcast %74 : vector<1x128xf32> to vector<16x128xf32>
    %76 = arith.addf %73, %75 : vector<16x128xf32>
    %c0_34 = arith.constant 0 : index
    %c0_35 = arith.constant 0 : index
    %77 = vector.load %arg7[%c0_34, %c0_35] : memref<16x128xf32, #tpu.memory_space<vmem>>, vector<16x128xf32>
    tpu.vector_store %arg7[%c0_34, %c0_35], %76 {strides = array<i32>} : memref<16x128xf32, #tpu.memory_space<vmem>>, vector<16x128xf32>,
    return
  }
}

</mosaic_0001>

<bundles_post_ra>
// kernel: tpu_custom_call.1
= control target key start
LH: loop header
LB: loop body
LE: loop exit
PB: predicated region body
PF: predicated region fallthrough
CT: control target
= control target key end

     0   :  { %12 = vsyncpa [#allocation3], 0  ;;  %s939_s0 = inlined_call_operand.hbm [shape: bf16[16,128], index: 0, kind: input, shape index: {}]   ;;  %s940_s1 = inlined_call_operand.hbm [shape: bf16[128,128], index: 1, kind: input, shape index: {}]   ;;  %s941_s2 = inlined_call_operand.vmem [shape: f32[2,128], index: 2, kind: input, shape index: {}]   ;;  %s942_s3 = inlined_call_operand.hbm [shape: bf16[128,128], index: 3, kind: input, shape index: {}]   ;;  %s943_s4 = inlined_call_operand.vmem [shape: f32[2,128], index: 4, kind: input, shape index: {}]   ;;  %s944_s5 = inlined_call_operand.hbm [shape: bf16[128,128], index: 5, kind: input, shape index: {}]   ;;  %s945_s6 = inlined_call_operand.vmem [shape: f32[1,128], index: 6, kind: input, shape index: {}]   ;;  %s946_s7 = inlined_call_operand.hbm [shape: f32[16,128], index: 7, kind: output, shape index: {}]  }
   0x1   :  { %13 = vsyncpa [#allocation6], 0 }
   0x2   :  { %14 = vsyncpa [#allocation9], 0 }
   0x3   :  { %15 = vsyncpa [#allocation4], 0  ;;  %s805_s24 = smov [#allocation5]   ;;  %s806_s26 = smov [#allocation2]  }
   0x4   :  { %s33_s25 = sshll.u32 %s805_s24, 4  ;;  %s21_s27 = sshll.u32 %s806_s26, 4  ;;  %s34_s25 = int_to_ptr.vmem [resolvable:$true] %s33_s25  ;;  %s22_s27 = int_to_ptr.vmem [resolvable:$true] %s21_s27 }
   0x5   :  { %s705_s28 = scalar_lea.vmem %s34_s25, 1024  ;;  %p710_p1 = scmp.lt.s32.totalorder %s34_s25, %s34_s25 }
   0x6   :  { %p706_p0 = scmp.ne.s32.totalorder %s34_s25, %s705_s28  ;;  %p711_p2 = scmp.lt.s32.totalorder %s705_s28, %s705_s28 }
   0x8   :  { %p712_p3 = por %p711_p2, %p710_p1 }
   0xa   :  { %p713_p4 = pnand %p712_p3, %p706_p0 }
   0xc   :  { %716 = shalt.err (!%p713_p4)
}
   0xd   :  { %s807_s29 = smov 64   ;;  %s808_s30 = smov 4  }
   0xe   :  { %39 = dma.hbm_to_vmem [thread:$0]  %s940_s1, 1024, %s34_s25, [#allocation6], %s807_s29, %s807_s29, %s808_s30  }
   0xf   :  { %s725_s10 = scalar_lea.vmem %s22_s27, 128  ;;  %p730_p6 = scmp.lt.s32.totalorder %s22_s27, %s22_s27 }
  0x10   :  { %p726_p5 = scmp.ne.s32.totalorder %s22_s27, %s725_s10  ;;  %p731_p7 = scmp.lt.s32.totalorder %s725_s10, %s725_s10 }
  0x12   :  { %p732_p8 = por %p731_p7, %p730_p6 }
  0x14   :  { %p733_p9 = pnand %p732_p8, %p726_p5 }
  0x16   :  { %736 = shalt.err (!%p733_p9)
}
  0x17   :  { %27 = dma.hbm_to_vmem [thread:$0]  %s939_s0, 128, %s22_s27, [#allocation3], %s807_s29, %s807_s29, %s808_s30  }
  0x18   :  { %s809_s13 = smov [#allocation7]   ;;  %s810_s15 = smov [#allocation8]  }
  0x19   :  { %s47_s14 = sshll.u32 %s809_s13, 4  ;;  %s61_s16 = sshll.u32 %s810_s15, 4  ;;  %s48_s14 = int_to_ptr.vmem [resolvable:$true] %s47_s14  ;;  %s62_s16 = int_to_ptr.vmem [resolvable:$true] %s61_s16 }
  0x1a   :  { %s745_s1 = scalar_lea.vmem %s48_s14, 1024  ;;  %p750_p11 = scmp.lt.s32.totalorder %s48_s14, %s48_s14 }
  0x1b   :  { %p746_p10 = scmp.ne.s32.totalorder %s48_s14, %s745_s1  ;;  %p751_p12 = scmp.lt.s32.totalorder %s745_s1, %s745_s1 }
  0x1d   :  { %p752_p13 = por %p751_p12, %p750_p11 }
  0x1f   :  { %p753_p0 = pnand %p752_p13, %p746_p10 }
  0x21   :  { %756 = shalt.err (!%p753_p0)
}
  0x22   :  { %53 = dma.hbm_to_vmem [thread:$0]  %s942_s3, 1024, %s48_s14, [#allocation6], %s807_s29, %s807_s29, %s808_s30  }
  0x23   :  { %s765_s0 = scalar_lea.vmem %s62_s16, 1024  ;;  %p770_p2 = scmp.lt.s32.totalorder %s62_s16, %s62_s16 }
  0x24   :  { %p766_p1 = scmp.ne.s32.totalorder %s62_s16, %s765_s0  ;;  %p771_p3 = scmp.lt.s32.totalorder %s765_s0, %s765_s0 }
  0x26   :  { %p772_p4 = por %p771_p3, %p770_p2 }
  0x28   :  { %p773_p5 = pnand %p772_p4, %p766_p1 }
  0x2a   :  { %776 = shalt.err (!%p773_p5)
}
  0x2b   :  { %67 = dma.hbm_to_vmem [thread:$0]  %s944_s5, 1024, %s62_s16, [#allocation9], %s807_s29, %s807_s29, %s808_s30  }
  0x2c   :  { %797 = dma.done.wait [#allocation3], 128  }
  0x2d   :  { %798 = vsyncadd [#allocation3], 4294967168 }
  0x2e   :  { %799 = dma.done.wait [#allocation6], 2048  }
  0x2f   :  { %800 = vsyncadd [#allocation6], 4294965248 }
  0x30   :  { %801 = dma.done.wait [#allocation9], 1024  }
  0x31   :  { %802 = vsyncadd [#allocation9], 4294966272  ;;  %v811_v0 = vmov 0.0   ;;  %vm812_vm0 = vmmov 0   ;;  %v668_v1 = vld [vmem:[#allocation5 + $0x38] sm:$0xff]   ;;  %v669_v2 = vld [vmem:[#allocation5 + $0x30] sm:$0xff]   ;;  %v229_v44 = vlaneseq }
  0x32   :  { %596 = vmatprep.subr.bf16.mxu0 %v811_v0  ;;  %612 = vmatprep.mubr.msk.bf16.mxu0 %vm812_vm0, %v811_v0  ;;  %v670_v3 = vld [vmem:[#allocation5 + $0x28] sm:$0xff]   ;;  %v671_v4 = vld [vmem:[#allocation5 + $0x20] sm:$0xff]   ;;  %v672_v5 = vld [vmem:[#allocation5 + $0x18] sm:$0xff]   ;;  %vm813_vm2 = vmmov 1  }
  0x33   :  { %616 = vmatprep.subr.bf16.mxu1 %v811_v0  ;;  %632 = vmatprep.mubr.msk.bf16.mxu1 %vm812_vm0, %v811_v0  ;;  %v673_v6 = vld [vmem:[#allocation5 + $0x10] sm:$0xff]   ;;  %v674_v7 = vld [vmem:[#allocation5 + $0x8] sm:$0xff]   ;;  %v675_v8 = vld [vmem:[#allocation5] sm:$0xff]   ;;  %v230_v45 = vshrl.u32 %v229_v44, 7 }
  0x34   :  { %597 = vmatpush3.bf16.msra.mxu0 %v668_v1  ;;  %v676_v9 = vld [vmem:[#allocation2] sm:$0xff]   ;;  %v678_v11 = vld [vmem:[#allocation7 + $0x30] sm:$0xff]   ;;  %v679_v12 = vld [vmem:[#allocation7 + $0x28] sm:$0xff]  }
  0x35   :  { %598 = vmatprep.subr.bf16.mxu0 %v811_v0  ;;  %v677_v10 = vld [vmem:[#allocation7 + $0x38] sm:$0xff]   ;;  %v680_v13 = vld [vmem:[#allocation7 + $0x20] sm:$0xff]   ;;  %v682_v15 = vld [vmem:[#allocation7 + $0x10] sm:$0xff]   ;;  %v907_v47 = vsub.s32 0, %v230_v45 }
  0x36   :  { %617 = vmatpush3.bf16.msra.mxu1 %v677_v10  ;;  %v681_v14 = vld [vmem:[#allocation7 + $0x18] sm:$0xff]   ;;  %v683_v16 = vld [vmem:[#allocation7 + $0x8] sm:$0xff]   ;;  %v684_v17 = vld [vmem:[#allocation7] sm:$0xff]  }
  0x37   :  { %618 = vmatprep.subr.bf16.mxu1 %v811_v0  ;;  %v90_v46 = vld [vmem:[%s941_s2] sm:$0x1]  ;;  %v91_v50 = vld [vmem:[%s941_s2 + $0x1] sm:$0x1]  ;;  %v686_v59 = vld [vmem:[#allocation8 + $0x30] sm:$0xff]  }
  0x38   :  { %599 = vmatpush3.bf16.msra.mxu0 %v669_v2  ;;  %v685_v58 = vld [vmem:[#allocation8 + $0x38] sm:$0xff]   ;;  %v687_v60 = vld [vmem:[#allocation8 + $0x28] sm:$0xff]   ;;  %v688_v61 = vld [vmem:[#allocation8 + $0x20] sm:$0xff]  }
  0x39   :  { %600 = vmatprep.subr.bf16.mxu0 %v811_v0  ;;  %v689_v62 = vld [vmem:[#allocation8 + $0x18] sm:$0xff]   ;;  %v690_v63 = vld [vmem:[#allocation8 + $0x10] sm:$0xff]   ;;  %v691_v1 = vld [vmem:[#allocation8 + $0x8] sm:$0xff]  }
  0x3a   :  { %619 = vmatpush3.bf16.msra.mxu1 %v678_v11  ;;  %v692_v2 = vld [vmem:[#allocation8] sm:$0xff]  }
  0x3b   :  { %620 = vmatprep.subr.bf16.mxu1 %v811_v0 }
  0x3c   :  { %601 = vmatpush3.bf16.msra.mxu0 %v670_v3 }
  0x3d   :  { %602 = vmatprep.subr.bf16.mxu0 %v811_v0 }
  0x3e   :  { %621 = vmatpush3.bf16.msra.mxu1 %v679_v12 }
  0x3f   :  { %622 = vmatprep.subr.bf16.mxu1 %v811_v0 }
  0x40   :  { %603 = vmatpush3.bf16.msra.mxu0 %v671_v4 }
  0x41   :  { %604 = vmatprep.subr.bf16.mxu0 %v811_v0 }
  0x42   :  { %623 = vmatpush3.bf16.msra.mxu1 %v680_v13 }
  0x43   :  { %624 = vmatprep.subr.bf16.mxu1 %v811_v0 }
  0x44   :  { %605 = vmatpush3.bf16.msra.mxu0 %v672_v5 }
  0x45   :  { %606 = vmatprep.subr.bf16.mxu0 %v811_v0 }
  0x46   :  { %625 = vmatpush3.bf16.msra.mxu1 %v681_v14 }
  0x47   :  { %626 = vmatprep.subr.bf16.mxu1 %v811_v0 }
  0x48   :  { %607 = vmatpush3.bf16.msra.mxu0 %v673_v6 }
  0x49   :  { %608 = vmatprep.subr.bf16.mxu0 %v811_v0 }
  0x4a   :  { %627 = vmatpush3.bf16.msra.mxu1 %v682_v15 }
  0x4b   :  { %628 = vmatprep.subr.bf16.mxu1 %v811_v0 }
  0x4c   :  { %609 = vmatpush3.bf16.msra.mxu0 %v674_v7 }
  0x4d   :  { %610 = vmatprep.subr.bf16.mxu0 %v811_v0 }
  0x4e   :  { %629 = vmatpush3.bf16.msra.mxu1 %v683_v16 }
  0x4f   :  { %630 = vmatprep.subr.bf16.mxu1 %v811_v0 }
  0x50   :  { %611 = vmatpush3.bf16.msra.mxu0 %v675_v8 }
  0x51   :  { %636 = vmatprep.subr.bf16.mxu0 %v811_v0 }
  0x52   :  { %631 = vmatpush3.bf16.msra.mxu1 %v684_v17 }
  0x53   :  { %613 = vmatmul.mubr.bf16.vlgmr.msra.gmra.mxu0 %v676_v9 }
  0x54   :  { %652 = vmatprep.mubr.msk.bf16.mxu0 %vm812_vm0, %v811_v0  ;;  %637 = vmatpush3.bf16.msra.mxu0 %v685_v58 }
  0x55   :  { %638 = vmatprep.subr.bf16.mxu0 %v811_v0 }
  0x58   :  { %639 = vmatpush3.bf16.msra.mxu0 %v686_v59 }
  0x59   :  { %640 = vmatprep.subr.bf16.mxu0 %v811_v0 }
  0x5c   :  { %641 = vmatpush3.bf16.msra.mxu0 %v687_v60 }
  0x5d   :  { %642 = vmatprep.subr.bf16.mxu0 %v811_v0 }
  0x60   :  { %643 = vmatpush3.bf16.msra.mxu0 %v688_v61 }
  0x61   :  { %644 = vmatprep.subr.bf16.mxu0 %v811_v0 }
  0x64   :  { %645 = vmatpush3.bf16.msra.mxu0 %v689_v62 }
  0x65   :  { %646 = vmatprep.subr.bf16.mxu0 %v811_v0 }
  0x68   :  { %647 = vmatpush3.bf16.msra.mxu0 %v690_v63 }
  0x69   :  { %648 = vmatprep.subr.bf16.mxu0 %v811_v0 }
  0x6c   :  { %649 = vmatpush3.bf16.msra.mxu0 %v691_v1 }
  0x6d   :  { %650 = vmatprep.subr.bf16.mxu0 %v811_v0 }
  0x70   :  { %651 = vmatpush3.bf16.msra.mxu0 %v692_v2 }
 0x113   :  { %v196_v18 = vpop.f32.mrf.mxu0 }
 0x114   :  { %v210_v21 = vmul.f32 %v196_v18, %v196_v18 }
 0x115   :  { %v614_v19 = vpop.f32.mrf.mxu0 }
 0x117   :  { %v199_v20 = vpop.f32.mrf.mxu0 }
 0x118   :  { %v203_v22 = vadd.f32 %v199_v20, %v196_v18  ;;  %v211_v23 = vmul.f32 %v199_v20, %v199_v20 }
 0x119   :  { %v615_v24 = vpop.f32.mrf.mxu0 }
 0x11a   :  { %v204_v25 = vrot.slane %v203_v22, 4  ;;  %v212_v26 = vadd.f32 %v211_v23, %v210_v21 }
 0x11c   :  { %v205_v27 = vadd.f32 %v204_v25, %v203_v22  ;;  %v213_v28 = vrot.slane %v212_v26, 4 }
 0x11e   :  { %v206_v29 = vrot.slane %v205_v27, 2  ;;  %v214_v30 = vadd.f32 %v213_v28, %v212_v26 }
 0x120   :  { %v207_v31 = vadd.f32 %v206_v29, %v205_v27  ;;  %v215_v32 = vrot.slane %v214_v30, 2  ;;  %v252_v29 = vld [vmem:[%s943_s4] sm:$0x1] }
 0x122   :  { %v208_v33 = vrot.slane %v207_v31, 1  ;;  %v216_v34 = vadd.f32 %v215_v32, %v214_v30  ;;  %v253_v32 = vld [vmem:[%s943_s4 + $0x1] sm:$0x1]  ;;  %s814_s4 = smov [#allocation10]  }
 0x123   :  { %s523_s28 = sshll.u32 %s814_s4, 4  ;;  %s524_s28 = int_to_ptr.vmem [resolvable:$true] %s523_s28 }
 0x124   :  { %v209_v35 = vadd.f32 %v208_v33, %v207_v31  ;;  %v217_v36 = vrot.slane %v216_v34, 1  ;;  %s777_s29 = scalar_lea.vmem %s524_s28, 256  ;;  %p782_p7 = scmp.lt.s32.totalorder %s524_s28, %s524_s28 }
 0x125   :  { %p778_p6 = scmp.ne.s32.totalorder %s524_s28, %s777_s29  ;;  %p783_p8 = scmp.lt.s32.totalorder %s777_s29, %s777_s29 }
 0x126   :  { %v218_v37 = vadd.f32 %v217_v36, %v216_v34  ;;  %v219_v38 = vmul.f32 0.125, %v209_v35 }
 0x127   :  { %p784_p9 = por %p783_p8, %p782_p7 }
 0x128   :  { %v220_v39 = vmul.f32 0.125, %v218_v37  ;;  %v221_v40 = vmul.f32 %v219_v38, %v219_v38 }
 0x129   :  { %p785_p10 = pnand %p784_p9, %p778_p6 }
 0x12a   :  { %v222_v41 = vsub.f32 %v220_v39, %v221_v40  ;;  %v557_v40 = vld [vmem:[%s945_s6] ss:$0 sm:$0xff] }
 0x12c   :  { %v223_v42 = vmax.f32 %v222_v41, 0.0 }
 0x12e   :  { %v224_v43 = vadd.f32 1e-05, %v223_v42 }
 0x130   :  { %693 = vrsqrt.f32 %v224_v43 }
 0x13d   :  { %v694_v48 = vpop.eup %693 }
 0x13e   :  { %v226_v49 = vmul.f32 %v694_v48, %v90_v46 }
 0x140   :  { %v227_v51 = vmul.f32 %v226_v49, %v219_v38  ;;  %v232_v52 = vrot.slane %v226_v49, %v907_v47 }
 0x142   :  { %v228_v53 = vsub.f32 %v91_v50, %v227_v51  ;;  %v233_v54 = vmul.f32 %v232_v52, %v196_v18 }
 0x144   :  { %v238_v55 = vrot.slane %v228_v53, %v907_v47 }
 0x146   :  { %v239_v56 = vadd.f32 %v238_v55, %v233_v54 }
 0x148   :  { %vm241_vm1 = vcmp.gt.f32.partialorder %v239_v56, 0.0  ;;  %v555_v57 = vpack.c.bf16 %v811_v0, %v239_v56 }
 0x149   :  { %vm554_vm3 = vmpackc.low %vm813_vm2, %vm241_vm1 }
 0x14a   :  { %633 = vmatmul.mubr.msk.bf16.vlgmr.msra.gmra.mxu1 %vm554_vm3, %v555_v57 }
 0x20a   :  { %v352_v3 = vpop.f32.mrf.mxu1 }
 0x20b   :  { %v366_v6 = vmul.f32 %v352_v3, %v352_v3 }
 0x20c   :  { %v634_v4 = vpop.f32.mrf.mxu1 }
 0x20e   :  { %v355_v5 = vpop.f32.mrf.mxu1 }
 0x20f   :  { %v359_v7 = vadd.f32 %v355_v5, %v352_v3  ;;  %v367_v8 = vmul.f32 %v355_v5, %v355_v5 }
 0x210   :  { %v635_v9 = vpop.f32.mrf.mxu1 }
 0x211   :  { %v360_v10 = vrot.slane %v359_v7, 4  ;;  %v368_v11 = vadd.f32 %v367_v8, %v366_v6 }
 0x213   :  { %v361_v12 = vadd.f32 %v360_v10, %v359_v7  ;;  %v369_v13 = vrot.slane %v368_v11, 4 }
 0x215   :  { %v362_v14 = vrot.slane %v361_v12, 2  ;;  %v370_v15 = vadd.f32 %v369_v13, %v368_v11 }
 0x217   :  { %v363_v16 = vadd.f32 %v362_v14, %v361_v12  ;;  %v371_v17 = vrot.slane %v370_v15, 2 }
 0x219   :  { %v364_v18 = vrot.slane %v363_v16, 1  ;;  %v372_v19 = vadd.f32 %v371_v17, %v370_v15 }
 0x21b   :  { %v365_v20 = vadd.f32 %v364_v18, %v363_v16  ;;  %v373_v21 = vrot.slane %v372_v19, 1 }
 0x21d   :  { %v374_v22 = vadd.f32 %v373_v21, %v372_v19  ;;  %v375_v23 = vmul.f32 0.125, %v365_v20 }
 0x21f   :  { %v376_v24 = vmul.f32 0.125, %v374_v22  ;;  %v377_v25 = vmul.f32 %v375_v23, %v375_v23 }
 0x221   :  { %v378_v26 = vsub.f32 %v376_v24, %v377_v25 }
 0x223   :  { %v379_v27 = vmax.f32 %v378_v26, 0.0 }
 0x225   :  { %v380_v28 = vadd.f32 1e-05, %v379_v27 }
 0x227   :  { %695 = vrsqrt.f32 %v380_v28 }
 0x234   :  { %v696_v30 = vpop.eup %695 }
 0x235   :  { %v382_v31 = vmul.f32 %v696_v30, %v252_v29 }
 0x237   :  { %v383_v33 = vmul.f32 %v382_v31, %v375_v23  ;;  %v388_v34 = vrot.slane %v382_v31, %v907_v47 }
 0x239   :  { %v384_v35 = vsub.f32 %v253_v32, %v383_v33  ;;  %v389_v36 = vmul.f32 %v388_v34, %v352_v3 }
 0x23b   :  { %v394_v37 = vrot.slane %v384_v35, %v907_v47 }
 0x23d   :  { %v395_v38 = vadd.f32 %v394_v37, %v389_v36 }
 0x23f   :  { %vm397_vm4 = vcmp.gt.f32.partialorder %v395_v38, 0.0  ;;  %v567_v39 = vpack.c.bf16 %v811_v0, %v395_v38 }
 0x240   :  { %vm566_vm5 = vmpackc.low %vm813_vm2, %vm397_vm4 }
 0x241   :  { %653 = vmatmul.mubr.msk.bf16.vlgmr.msra.gmra.mxu0 %vm566_vm5, %v567_v39 }
 0x301   :  { %v509_v41 = vpop.f32.mrf.mxu0 }
 0x302   :  { %v510_v42 = vadd.f32 %v557_v40, %v509_v41 }
 0x303   :  { %v654_v43 = vpop.f32.mrf.mxu0 }
 0x304   :  { %516 = vst [vmem:[#allocation10] sm:$0xff] %v510_v42 }
 0x305   :  { %v512_v44 = vpop.f32.mrf.mxu0 }
 0x306   :  { %v513_v45 = vadd.f32 %v557_v40, %v512_v44 }
 0x307   :  { %v655_v46 = vpop.f32.mrf.mxu0 }
 0x308   :  { %517 = vst [vmem:[#allocation10 + $0x8] sm:$0xff] %v513_v45 }
 0x309   :  { %788 = shalt.err (!%p785_p10)
}
 0x30a   :  { %s815_s30 = smov 128   ;;  %s816_s6 = smov 8  }
 0x30b   :  { %529 = dma.vmem_to_hbm [thread:$0]  %s524_s28, 256, %s946_s7, [#allocation4], %s815_s30, %s815_s30, %s816_s6  }
 0x30c   :  { %803 = dma.done.wait [#allocation4], 256  }
 0x30d   :  { %804 = vsyncadd [#allocation4], 4294967040 }
 0x30e   :  { %533 = vsyncpa [#allocation3], 1 }
 0x30f   :  { %534 = vsyncpa [#allocation6], 1 }
 0x310   :  { %535 = vsyncpa [#allocation9], 1 }
 0x311   :  { %536 = vsyncpa [#allocation4], 1 }

</bundles_post_ra>
